<compile_context>
chip_gen: v5e
topology: v5e:2x2
jax: 0.10.0
libtpu: 0.0.40
codegen_flags: <defaults>
</compile_context>

<pallas_src>
import functools

import jax
import jax.numpy as jnp
from jax.experimental import pallas as pl
from jax.experimental.pallas import tpu as pltpu

NEG_SLOPE = 0.1
BN_EPS = 1e-5


# ---------------------------------------------------------------------------
# Import-time probe of pltpu.roll's rotation convention (trace-safe: runs
# exactly once, eagerly, at module import -- never inside a jit trace).
# ---------------------------------------------------------------------------

def _probe_roll_convention():
    def k(x_ref, o_ref):
        o_ref[...] = pltpu.roll(x_ref[...], 1, 1)

    x = jax.lax.broadcasted_iota(jnp.float32, (8, 128), 1)
    y = pl.pallas_call(k, out_shape=jax.ShapeDtypeStruct((8, 128), jnp.float32))(x)
    v = float(y[0, 1])
    if v == 0.0:   # matches jnp.roll: out[j] = x[j - shift]
        return -1
    if v == 2.0:   # opposite convention: out[j] = x[j + shift]
        return 1
    raise RuntimeError(f"Unexpected pltpu.roll convention (probe read {v}).")


_ROLL_SIGN = _probe_roll_convention()


# ---------------------------------------------------------------------------
# Host-side helpers
# ---------------------------------------------------------------------------

def _tap_masks_host(H, W):
    """(9, P) bf16 validity mask per 3x3 tap for the lane-flattened P = H*W.

    Computed on the host once per call (outside the kernel grid) and passed
    as a resident input; dy==0 / dx==0 taps only need the horizontal /
    vertical component, the centre tap (all ones) is skipped in-kernel.
    """
    P = H * W
    pos = jnp.arange(P, dtype=jnp.int32)
    h = pos // W
    w = pos % W
    rows = []
    for t in range(9):
        dy, dx = t // 3 - 1, t % 3 - 1
        ok = jnp.ones((P,), jnp.bool_)
        if dy != 0:
            ok = ok & ((h + dy) >= 0) & ((h + dy) < H)
        if dx != 0:
            ok = ok & ((w + dx) >= 0) & ((w + dx) < W)
        rows.append(ok)
    return jnp.stack(rows, axis=0).astype(jnp.bfloat16)


def _vmem_limit_bytes():
    """Per-generation VMEM scoped limit: capacity minus ~25% headroom
    (~96 MiB on v5e/v6e's 128 MiB, ~48 MiB on v7x's 64 MiB)."""
    try:
        cap = int(pltpu.get_tpu_info().vmem_capacity_bytes)
    except Exception:  # introspection unavailable -> conservative default
        cap = 64 * 1024 * 1024
    return max(int(cap * 3 // 4), 32 * 1024 * 1024)


# ---------------------------------------------------------------------------
# Fused in-kernel layers (activations are (C, P) bf16, P = H*W on the lanes)
# ---------------------------------------------------------------------------

def _leaky(y):
    # LeakyReLU(0.1): max(y, 0.1*y) (valid since 0 < slope < 1).
    return jnp.maximum(y, NEG_SLOPE * y)


def _conv1x1(x_bf16, w_ref, b_ref, out_dtype=jnp.bfloat16):
    """x: (Cin, P) bf16; w: (Cout, Cin) bf16; b: (Cout, 1) f32."""
    y = jnp.dot(w_ref[...], x_bf16, preferred_element_type=jnp.float32)
    return _leaky(y + b_ref[...]).astype(out_dtype)


def _conv3x3(x_bf16, w_ref, b_ref, masks, W, out_dtype=jnp.bfloat16):
    """3x3 conv, stride 1, implicit zero pad 1, on lane-flattened spatial.

    x: (Cin, P) bf16; w: (Cout, 9*Cin) bf16 with column index t*Cin + c,
    tap t = ky*3 + kx; b: (Cout, 1) f32; masks: (9, P) bf16 (host-built).

    Each tap is a lane roll (XLU, off the vld/vst/VALU path) by
    (ky-1)*W + (kx-1) followed by a mask multiply; the 9 copies are stacked
    along the contraction axis so the whole conv is ONE MXU matmul with
    K = 9*Cin instead of 9 small K=Cin matmuls.
    """
    P = x_bf16.shape[1]
    taps = []
    for t in range(9):
        dy, dx = t // 3 - 1, t % 3 - 1
        off = dy * W + dx
        if off == 0:
            xs = x_bf16
        else:
            xs = pltpu.roll(x_bf16, (_ROLL_SIGN * off) % P, 1)
        if t != 4:                       # centre tap mask is all-ones: skip it
            xs = xs * masks[t:t + 1, :]  # (Cin,P) * (1,P) -> (Cin,P) bf16
        taps.append(xs)
    stacked = jnp.concatenate(taps, axis=0)                      # (9*Cin, P)
    y = jnp.dot(w_ref[...], stacked, preferred_element_type=jnp.float32)
    return _leaky(y + b_ref[...]).astype(out_dtype)


def _detection_block_kernel(x_ref, masks_ref,
                            w1, b1, w2, b2, w3, b3, w4, b4, w5, b5,
                            o_ref, *, W):
    masks = masks_ref[...]                                       # (9, P) bf16
    x = x_ref[0]                                                 # (Cin, P) bf16
    t = _conv1x1(x, w1, b1)                                      # (C,  P)
    t = _conv3x3(t, w2, b2, masks, W)                            # (2C, P)
    t = _conv1x1(t, w3, b3)                                      # (C,  P)
    # TODO(synk): spp branch (maxpool 5/9/13 + concat + conv_spp) not implemented
    t = _conv3x3(t, w4, b4, masks, W)                            # (2C, P)
    # TODO(synk): attention_sam branch (1x1 conv+BN+sigmoid gate) not implemented
    o_ref[0] = _conv1x1(t, w5, b5, out_dtype=o_ref.dtype)        # (C,  P)


# ---------------------------------------------------------------------------
# Wrapper
# ---------------------------------------------------------------------------

def detection_block_forward(x_nchw, params, *, out_dtype=jnp.bfloat16,
                            single_buffer_consts=True):
    """Forward pass of DetectionBlock. Input/output are NCHW (PyTorch layout).

    Activations enter/leave the kernel as bf16 (halves HBM traffic); set
    out_dtype=jnp.float32 if the consumer needs full precision.
    """
    N, Cin, H, W = x_nchw.shape
    P = H * W                          # spatial lives on the 128-lane axis
    w1, b1 = params["conv1"]
    w2, b2 = params["conv2"]
    w3, b3 = params["conv3"]
    w4, b4 = params["conv4"]
    w5, b5 = params["conv5"]
    weights = (w1, b1, w2, b2, w3, b3, w4, b4, w5, b5)
    Cout = w5.shape[0]

    masks = _tap_masks_host(H, W)                  # (9, P) bf16, resident
    xf = x_nchw.astype(jnp.bfloat16).reshape(N, Cin, P)   # free reshape, bf16 in

    def resident(a):
        # Whole-array block, constant index_map -> fetched once, stays in
        # VMEM across grid steps. Buffered(1) keeps constants single-buffered.
        if single_buffer_consts:
            return pl.BlockSpec(a.shape, lambda n, _nd=a.ndim: (0,) * _nd,
                                pipeline_mode=pl.Buffered(1))
        return pl.BlockSpec(a.shape, lambda n, _nd=a.ndim: (0,) * _nd)

    kernel = functools.partial(_detection_block_kernel, W=W)

    out = pl.pallas_call(
        kernel,
        out_shape=jax.ShapeDtypeStruct((N, Cout, P), out_dtype),
        grid_spec=pltpu.PrefetchScalarGridSpec(
            num_scalar_prefetch=0,
            grid=(N,),
            in_specs=[pl.BlockSpec((1, Cin, P), lambda n: (n, 0, 0)),
                      resident(masks)]
                     + [resident(a) for a in weights],
            out_specs=pl.BlockSpec((1, Cout, P), lambda n: (n, 0, 0)),
        ),
        compiler_params=pltpu.CompilerParams(
            dimension_semantics=("parallel",),
            vmem_limit_bytes=_vmem_limit_bytes()),
    )(xf, masks, *weights)

    return out.reshape(N, Cout, H, W)


# ---------------------------------------------------------------------------
# Parameter construction (deterministic; BN folded into conv; bf16 weights)
# ---------------------------------------------------------------------------

def _init_conv_bn(key, cin, cout, ksize):
    kw, kg, kb, km, kv = jax.random.split(key, 5)
    w = 0.1 * jax.random.normal(kw, (cout, cin, ksize, ksize), jnp.float32)  # OIHW
    gamma = 1.0 + 0.1 * jax.random.normal(kg, (cout,), jnp.float32)
    beta = 0.1 * jax.random.normal(kb, (cout,), jnp.float32)
    mean = 0.1 * jax.random.normal(km, (cout,), jnp.float32)
    var = 1.0 + 0.1 * jnp.abs(jax.random.normal(kv, (cout,), jnp.float32))
    scale = gamma / jnp.sqrt(var + BN_EPS)                 # (cout,)
    w = w * scale[:, None, None, None]                     # fold BN scale
    b = (beta - mean * scale).reshape(cout, 1)             # folded bias, f32
    if ksize == 1:
        wk = w[:, :, 0, 0]                                  # (cout, cin)
    else:
        # (cout, cin, 3, 3) -> (cout, 9*cin), column index (ky*3+kx)*cin + c
        wk = jnp.transpose(w, (0, 2, 3, 1)).reshape(cout, ksize * ksize * cin)
    return wk.astype(jnp.bfloat16), b.astype(jnp.float32)


def init_detection_block_params(key, in_channels, out_channels):
    double = out_channels * 2
    keys = jax.random.split(key, 5)
    return {
        "conv1": _init_conv_bn(keys[0], in_channels, out_channels, 1),
        "conv2": _init_conv_bn(keys[1], out_channels, double, 3),
        "conv3": _init_conv_bn(keys[2], double, out_channels, 3 if False else 1),
        "conv4": _init_conv_bn(keys[3], out_channels, double, 3),
        "conv5": _init_conv_bn(keys[4], double, out_channels, 1),
    }


# ---------------------------------------------------------------------------
# Pure-XLA reference (same bf16-weights / bf16-activations / f32-accumulate)
# ---------------------------------------------------------------------------

def detection_block_reference(x_nchw, params):
    def conv(x, wk, b, ksize):
        if ksize == 1:
            w_oihw = wk[:, :, None, None]
        else:
            cout = wk.shape[0]
            cin = wk.shape[1] // 9
            w_oihw = jnp.transpose(wk.reshape(cout, 3, 3, cin), (0, 3, 1, 2))
        pad = (ksize - 1) // 2
        y = jax.lax.conv_general_dilated(
            x.astype(jnp.bfloat16), w_oihw.astype(jnp.bfloat16),
            window_strides=(1, 1), padding=[(pad, pad), (pad, pad)],
            dimension_numbers=("NCHW", "OIHW", "NCHW"),
            preferred_element_type=jnp.float32)
        y = y + b.reshape(1, -1, 1, 1)
        return jnp.maximum(y, NEG_SLOPE * y)

    t = conv(x_nchw, *params["conv1"], 1)
    t = conv(t, *params["conv2"], 3)
    t = conv(t, *params["conv3"], 1)
    t = conv(t, *params["conv4"], 3)
    return conv(t, *params["conv5"], 1)


# ---------------------------------------------------------------------------
# Main
# ---------------------------------------------------------------------------

if __name__ == "__main__":
    key = jax.random.PRNGKey(0)
    k_x, k_p = jax.random.split(key)

    N, C_IN, H, W = 2, 4, 16, 16
    C_OUT = 8

    x = jax.random.normal(k_x, (N, C_IN, H, W), jnp.float32)
    params = init_detection_block_params(k_p, C_IN, C_OUT)

    forward = jax.jit(detection_block_forward)     # trace-safe: roll probe ran at import
    try:
        out = forward(x, params)
        jax.block_until_ready(out)
    except Exception:
        # Fallback for JAX builds where BlockSpec(pipeline_mode=pl.Buffered(1))
        # is not supported: rebuild with default (double-buffered) constants.
        forward = jax.jit(functools.partial(detection_block_forward,
                                            single_buffer_consts=False))
        out = forward(x, params)
        jax.block_until_ready(out)

    assert out.shape == (N, C_OUT, H, W), out.shape
    assert out.dtype == jnp.bfloat16, out.dtype

    ref = detection_block_reference(x, params)
    out_f32 = out.astype(jnp.float32)
    err = float(jnp.max(jnp.abs(out_f32 - ref)))
    rel = float(jnp.linalg.norm(out_f32 - ref) /
                (float(jnp.linalg.norm(ref)) + 1e-12))
    assert err < 3e-2, f"max abs error vs reference: {err}"
    assert rel < 1e-1, f"relative L2 error vs reference: {rel}"

    print("KERNEL_OK")
</pallas_src>

<mosaic_0001>
module attributes {stable_mosaic.version = 11 : i64} {
  func.func @k(%arg0: memref<8x128xf32, #tpu.memory_space<vmem>>, %arg1: memref<8x128xf32, #tpu.memory_space<vmem>>) attributes {dimension_semantics = [], scalar_prefetch = 0 : i64, scratch_operands = 0 : i64, tpu.core_type = #tpu.core_type<tc>} {
    %c0 = arith.constant 0 : index
    %c0_0 = arith.constant 0 : index
    %0 = vector.load %arg0[%c0, %c0_0] : memref<8x128xf32, #tpu.memory_space<vmem>>, vector<8x128xf32>
    %c1_i32 = arith.constant 1 : i32
    %1 = tpu.dynamic_rotate %0 by %c1_i32 dim 1 : vector<8x128xf32>, i32 -> vector<8x128xf32>
    %c0_1 = arith.constant 0 : index
    %c0_2 = arith.constant 0 : index
    %2 = vector.load %arg1[%c0_1, %c0_2] : memref<8x128xf32, #tpu.memory_space<vmem>>, vector<8x128xf32>
    tpu.vector_store %arg1[%c0_1, %c0_2], %1 {strides = array<i32>} : memref<8x128xf32, #tpu.memory_space<vmem>>, vector<8x128xf32>,
    return
  }
}

</mosaic_0001>

<bundles_post_ra>
// kernel: tpu_custom_call.1
= control target key start
LH: loop header
LB: loop body
LE: loop exit
PB: predicated region body
PF: predicated region fallthrough
CT: control target
= control target key end

     0   :  { %6 = vsyncpa [#allocation3], 0  ;;  %s118_s0 = inlined_call_operand.hbm [shape: f32[8,128], index: 0, kind: input, shape index: {}]   ;;  %s119_s1 = inlined_call_operand.hbm [shape: f32[8,128], index: 1, kind: output, shape index: {}]  }
   0x1   :  { %7 = vsyncpa [#allocation4], 0  ;;  %s13_s8 = sshll.u32 %s118_s0, 4  ;;  %s99_s9 = smov [#allocation2]   ;;  %s14_s8 = int_to_ptr.hbm [resolvable:$true] %s13_s8 }
   0x2   :  { %s15_s10 = sshll.u32 %s99_s9, 4  ;;  %s16_s10 = int_to_ptr.vmem [resolvable:$true] %s15_s10 }
   0x3   :  { %18 = dma.hbm_to_vmem [thread:$0]  %s14_s8, 128, %s16_s10, [#allocation3]  }
   0x4   :  { %95 = dma.done.wait [#allocation3], 128  }
   0x5   :  { %96 = vsyncadd [#allocation3], 4294967168  ;;  %v23_v0 = vld [vmem:[#allocation2] sm:$0xff]  ;;  %s100_s11 = smov 1   ;;  %s101_s12 = smov [#allocation5]  }
   0x6   :  { %24 = vrot.lane.b32.xlu0 %v23_v0, %s100_s11  ;;  %s32_s13 = sshll.u32 %s101_s12, 4  ;;  %s34_s16 = sshll.u32 %s119_s1, 4  ;;  %s33_s13 = int_to_ptr.vmem [resolvable:$true] %s32_s13  ;;  %s35_s16 = int_to_ptr.hbm [resolvable:$true] %s34_s16 }
  0x78   :  { %v25_v1 = vpop.permute.xlu0 %24 }
  0x79   :  { %26 = vst [vmem:[#allocation5] sm:$0xff] %v25_v1 }
  0x7a   :  { %37 = dma.vmem_to_hbm [thread:$0]  %s33_s13, 128, %s35_s16, [#allocation4]  }
  0x7b   :  { %97 = dma.done.wait [#allocation4], 128  }
  0x7c   :  { %98 = vsyncadd [#allocation4], 4294967168 }
  0x7d   :  { %42 = vsyncpa [#allocation3], 1 }
  0x7e   :  { %43 = vsyncpa [#allocation4], 1 }

</bundles_post_ra>
